<compile_context>
chip_gen: v7x
topology: tpu7x:2x2x1
jax: 0.10.0
libtpu: 0.0.40
codegen_flags: <defaults>
</compile_context>

<pallas_src>
import functools

import jax
import jax.numpy as jnp
from jax.experimental import pallas as pl
from jax.experimental.pallas import tpu as pltpu


# ----------------------------------------------------------------------------
# Tiled MXU matmul kernels (bias-less and fused-bias variants).
# ----------------------------------------------------------------------------
def _matmul_kernel(a_ref, b_ref, o_ref, acc_ref):
    @pl.when(pl.program_id(2) == 0)
    def _():
        acc_ref[...] = jnp.zeros_like(acc_ref)

    acc_ref[...] += jnp.dot(
        a_ref[...], b_ref[...], preferred_element_type=jnp.float32
    )

    @pl.when(pl.program_id(2) == pl.num_programs(2) - 1)
    def _():
        o_ref[...] = acc_ref[...].astype(o_ref.dtype)


def _matmul_bias_kernel(a_ref, b_ref, bias_ref, o_ref, acc_ref):
    @pl.when(pl.program_id(2) == 0)
    def _():
        acc_ref[...] = jnp.zeros_like(acc_ref)

    acc_ref[...] += jnp.dot(
        a_ref[...], b_ref[...], preferred_element_type=jnp.float32
    )

    @pl.when(pl.program_id(2) == pl.num_programs(2) - 1)
    def _():
        # bias is kept f32 and added to the f32 accumulator (no pre-rounding).
        o_ref[...] = (acc_ref[...] + bias_ref[...]).astype(o_ref.dtype)


def _pick_block(dim, target, unit):
    """Largest `unit`-multiple divisor of `dim` that is <= target.

    Falls back to the full dim only when dim <= target or dim has no
    unit-multiple divisor (keeps VMEM bounded on v7x's 64 MiB).
    """
    if dim <= target:
        return dim
    cand = (target // unit) * unit
    while cand >= unit:
        if dim % cand == 0:
            return cand
        cand -= unit
    # TODO(synk): masked-tail grid (pl.cdiv) for huge non-unit-multiple dims.
    return dim


def linear(a, w, bias=None, *, out_dtype=None, tm=256, tn=256, tk=512):
    """y = a @ w (+ bias), tiled Pallas MXU matmul with f32 accumulation."""
    M, K = a.shape
    K2, Nn = w.shape
    assert K == K2, (a.shape, w.shape)
    out_dtype = jnp.dtype(out_dtype) if out_dtype is not None else a.dtype

    bm = _pick_block(M, tm, 8)
    bn = _pick_block(Nn, tn, 128)
    bk = _pick_block(K, tk, 128)
    # Guarantee a >=2-extent "parallel" axis when possible so both v7x
    # TensorCores get work (degenerate (1,1,k) grids leave half the chip idle).
    if M // bm == 1 and Nn // bn == 1 and bm % 16 == 0:
        bm //= 2

    grid = (M // bm, Nn // bn, K // bk)
    itemsize = jnp.dtype(a.dtype).itemsize

    in_specs = [
        pl.BlockSpec((bm, bk), lambda i, j, k: (i, k)),
        pl.BlockSpec((bk, bn), lambda i, j, k: (k, j)),
    ]
    operands = [a, w]
    kernel = _matmul_kernel
    if bias is not None:
        in_specs.append(pl.BlockSpec((1, bn), lambda i, j, k: (0, j)))
        operands.append(bias.reshape(1, Nn).astype(jnp.float32))
        kernel = _matmul_bias_kernel

    return pl.pallas_call(
        kernel,
        out_shape=jax.ShapeDtypeStruct((M, Nn), out_dtype),
        grid_spec=pltpu.PrefetchScalarGridSpec(
            num_scalar_prefetch=0,
            grid=grid,
            in_specs=in_specs,
            out_specs=pl.BlockSpec((bm, bn), lambda i, j, k: (i, j)),
            scratch_shapes=[pltpu.VMEM((bm, bn), jnp.float32)],
        ),
        compiler_params=pltpu.CompilerParams(
            dimension_semantics=("parallel", "parallel", "arbitrary"),
            vmem_limit_bytes=32 * 1024 * 1024,
        ),
        cost_estimate=pl.CostEstimate(
            flops=2 * M * Nn * K,
            transcendentals=0,
            bytes_accessed=(M * K + K * Nn + M * Nn) * itemsize,
        ),
    )(*operands)


# ----------------------------------------------------------------------------
# Multi-head softmax attention: one batch element per grid step.
#
# Consumes the fused qkv activation (B, N, 3C) directly (columns [q | k | v],
# each head-blocked by d) and writes the merged-head output (B, N, C), so no
# wrapper-side transposes / HBM passes are needed. All heads of a batch
# element are processed in one step; the output store is lane-dense (C lanes).
# ----------------------------------------------------------------------------
def _mha_kernel(qkv_ref, o_ref, *, num_heads, scale):
    n, three_c = qkv_ref.shape
    c = three_c // 3
    d = c // num_heads

    scale_b = jnp.asarray(scale, dtype=qkv_ref.dtype)
    q = qkv_ref[:, 0:c] * scale_b          # scale folded into q (N*d muls)
    k = qkv_ref[:, c:2 * c]
    v = qkv_ref[:, 2 * c:3 * c]

    outs = []
    for h in range(num_heads):              # static unroll over heads
        sl = slice(h * d, (h + 1) * d)
        # s = q_h @ k_h^T  (bf16 operands, f32 accumulation on the MXU)
        s = jax.lax.dot_general(
            q[:, sl], k[:, sl], (((1,), (1,)), ((), ())),
            preferred_element_type=jnp.float32,
        )                                    # (N, N) f32
        m = jnp.max(s, axis=-1, keepdims=True)
        p = jnp.exp(s - m)
        l = jnp.sum(p, axis=-1, keepdims=True)
        p = p * pl.reciprocal(l, approx=True)        # EUP-slot reciprocal
        outs.append(
            jnp.dot(p.astype(v.dtype), v[:, sl],
                    preferred_element_type=jnp.float32)
        )                                    # (N, d) f32

    # Single lane-dense (N, C) store.
    o_ref[...] = jnp.concatenate(outs, axis=-1).astype(o_ref.dtype)


def mha_fused(qkv, *, num_heads, scale):
    """qkv: (B, N, 3C) with columns [q | k | v]; returns (B, N, C)."""
    # TODO(synk): for large N (N^2 f32 score tile approaching VMEM, esp. v7x's
    #             64 MiB) switch to a flash-style kv-tiled online-softmax
    #             kernel with an "arbitrary" kv grid axis and m/l/acc scratch.
    B, N, three_c = qkv.shape
    C = three_c // 3
    d = C // num_heads
    itemsize = jnp.dtype(qkv.dtype).itemsize

    return pl.pallas_call(
        functools.partial(_mha_kernel, num_heads=num_heads, scale=scale),
        out_shape=jax.ShapeDtypeStruct((B, N, C), qkv.dtype),
        grid_spec=pltpu.PrefetchScalarGridSpec(
            num_scalar_prefetch=0,
            grid=(B,),
            in_specs=[pl.BlockSpec((None, N, three_c), lambda b: (b, 0, 0))],
            out_specs=pl.BlockSpec((None, N, C), lambda b: (b, 0, 0)),
        ),
        compiler_params=pltpu.CompilerParams(
            dimension_semantics=("parallel",),
        ),
        cost_estimate=pl.CostEstimate(
            flops=4 * B * num_heads * N * N * d,
            transcendentals=B * num_heads * N * N,
            bytes_accessed=B * N * (three_c + C) * itemsize,
        ),
    )(qkv)


# ----------------------------------------------------------------------------
# Full Attention.forward (coord=False, sr_ratio=1, eval).
# ----------------------------------------------------------------------------
def attention_forward(x, w_q, w_kv, w_proj, b_proj, *, num_heads):
    B, N, C = x.shape
    assert C % num_heads == 0
    d = C // num_heads
    scale = d ** -0.5

    # Fused q/kv projection weight: columns [q | k | v] (matches the PyTorch
    # kv.reshape(B, N, 2, H, d) layout: k = kv cols [0:C], v = cols [C:2C]).
    w_qkv = jnp.concatenate([w_q, w_kv], axis=1).astype(jnp.bfloat16)

    x2 = x.reshape(B * N, C).astype(jnp.bfloat16)
    qkv = linear(x2, w_qkv, out_dtype=jnp.bfloat16)      # (B*N, 3C), no bias
    qkv = qkv.reshape(B, N, 3 * C)                        # free reshape only

    o = mha_fused(qkv, num_heads=num_heads, scale=scale)  # (B, N, C) bf16

    out = linear(o.reshape(B * N, C), w_proj.astype(jnp.bfloat16), b_proj,
                 out_dtype=x.dtype)                        # proj has bias
    # TODO(synk): attn_drop / proj_drop are identity at p=0.0 (eval mode).
    # TODO(synk): coord=True path (CoordAtt: adaptive pools + 1x1 convs + BN +
    #             h_swish) and sr_ratio>1 path (strided Conv2d + LayerNorm)
    #             are not implemented.
    return out.reshape(B, N, C)


# ----------------------------------------------------------------------------
# Pure-JAX f32 reference (mirrors the PyTorch forward, coord=False, sr=1).
# ----------------------------------------------------------------------------
def attention_ref(x, w_q, w_kv, w_proj, b_proj, *, num_heads):
    B, N, C = x.shape
    d = C // num_heads
    scale = d ** -0.5
    q = (x @ w_q).reshape(B, N, num_heads, d).transpose(0, 2, 1, 3)
    kv = (x @ w_kv).reshape(B, N, 2, num_heads, d).transpose(2, 0, 3, 1, 4)
    k, v = kv[0], kv[1]
    attn = (q @ jnp.swapaxes(k, -2, -1)) * scale
    attn = jax.nn.softmax(attn, axis=-1)
    o = (attn @ v).transpose(0, 2, 1, 3).reshape(B, N, C)
    return o @ w_proj + b_proj


if __name__ == "__main__":
    key = jax.random.PRNGKey(0)
    B, Hsp, Wsp = 2, 8, 8          # spatial H, W  -> sequence length N = H*W
    N = Hsp * Wsp                  # 64
    C = 128                        # dim
    num_heads = 8                  # head_dim = 16

    kx, kq, kkv, kp, kb = jax.random.split(key, 5)
    x = jax.random.normal(kx, (B, N, C), jnp.float32)
    w_q = jax.random.normal(kq, (C, C), jnp.float32) * (C ** -0.5)
    w_kv = jax.random.normal(kkv, (C, 2 * C), jnp.float32) * (C ** -0.5)
    w_proj = jax.random.normal(kp, (C, C), jnp.float32) * (C ** -0.5)
    b_proj = jax.random.normal(kb, (C,), jnp.float32) * 0.1

    y = attention_forward(x, w_q, w_kv, w_proj, b_proj, num_heads=num_heads)
    y = jax.block_until_ready(y)

    y_ref = attention_ref(x, w_q, w_kv, w_proj, b_proj, num_heads=num_heads)

    assert y.shape == (B, N, C) and y.dtype == x.dtype
    # Kernel path deliberately uses bf16 MXU operands (f32 accumulation / f32
    # softmax), compared against an f32 reference -> allow bf16-level slack.
    max_err = float(jnp.max(jnp.abs(y - y_ref)))
    assert jnp.allclose(y, y_ref, atol=5e-2, rtol=5e-2), max_err
    print("KERNEL_OK")
</pallas_src>

<mosaic_0001>
module attributes {stable_mosaic.version = 11 : i64} {
  func.func @_matmul_kernel(%arg0: i32, %arg1: i32, %arg2: i32, %arg3: memref<128x128xbf16, #tpu.memory_space<vmem>>, %arg4: memref<128x128xbf16, #tpu.memory_space<vmem>>, %arg5: memref<128x128xbf16, #tpu.memory_space<vmem>>, %arg6: memref<128x128xf32, #tpu.memory_space<vmem>>) attributes {dimension_semantics = [#tpu.dimension_semantics<parallel>, #tpu.dimension_semantics<parallel>, #tpu.dimension_semantics<arbitrary>], iteration_bounds = array<i64: 1, 3, 1>, scalar_prefetch = 0 : i64, scratch_operands = 1 : i64, tpu.core_type = #tpu.core_type<tc>, window_params = [{transform_indices = @transform_0, window_bounds = array<i64: 128, 128>}, {transform_indices = @transform_1, window_bounds = array<i64: 128, 128>}, {transform_indices = @transform_2, window_bounds = array<i64: 128, 128>}]} {
    %c0_i32 = arith.constant 0 : i32
    %0 = arith.cmpi eq, %arg2, %c0_i32 : i32
    %1 = arith.extui %0 : i1 to i32
    %c0_i32_0 = arith.constant 0 : i32
    %2 = arith.cmpi ne, %1, %c0_i32_0 : i32
    scf.if %2 {
      %cst_10 = arith.constant 0.000000e+00 : f32
      %12 = vector.broadcast %cst_10 : f32 to vector<128x128xf32>
      %c0_11 = arith.constant 0 : index
      %c0_12 = arith.constant 0 : index
      %13 = vector.load %arg6[%c0_11, %c0_12] : memref<128x128xf32, #tpu.memory_space<vmem>>, vector<128x128xf32>
      tpu.vector_store %arg6[%c0_11, %c0_12], %12 {strides = array<i32>} : memref<128x128xf32, #tpu.memory_space<vmem>>, vector<128x128xf32>,
    } else {
    }
    %c0 = arith.constant 0 : index
    %c0_1 = arith.constant 0 : index
    %3 = vector.load %arg6[%c0, %c0_1] : memref<128x128xf32, #tpu.memory_space<vmem>>, vector<128x128xf32>
    %c0_2 = arith.constant 0 : index
    %c0_3 = arith.constant 0 : index
    %4 = vector.load %arg3[%c0_2, %c0_3] : memref<128x128xbf16, #tpu.memory_space<vmem>>, vector<128x128xbf16>
    %c0_4 = arith.constant 0 : index
    %c0_5 = arith.constant 0 : index
    %5 = vector.load %arg4[%c0_4, %c0_5] : memref<128x128xbf16, #tpu.memory_space<vmem>>, vector<128x128xbf16>
    %cst = arith.constant dense<0.000000e+00> : vector<128x128xf32>
    %6 = tpu.matmul %4, %5, %cst {dimension_numbers = #tpu.dot_dimension_numbers<[1], [0], [0], [1], [0, 0, 1, 1], [], []>} : vector<128x128xbf16>, vector<128x128xbf16>, vector<128x128xf32> -> vector<128x128xf32>
    %7 = arith.addf %3, %6 : vector<128x128xf32>
    %c0_6 = arith.constant 0 : index
    %c0_7 = arith.constant 0 : index
    %8 = vector.load %arg6[%c0_6, %c0_7] : memref<128x128xf32, #tpu.memory_space<vmem>>, vector<128x128xf32>
    tpu.vector_store %arg6[%c0_6, %c0_7], %7 {strides = array<i32>} : memref<128x128xf32, #tpu.memory_space<vmem>>, vector<128x128xf32>,
    %c0_i32_8 = arith.constant 0 : i32
    %9 = arith.cmpi eq, %arg2, %c0_i32_8 : i32
    %10 = arith.extui %9 : i1 to i32
    %c0_i32_9 = arith.constant 0 : i32
    %11 = arith.cmpi ne, %10, %c0_i32_9 : i32
    scf.if %11 {
      %c0_10 = arith.constant 0 : index
      %c0_11 = arith.constant 0 : index
      %12 = vector.load %arg6[%c0_10, %c0_11] : memref<128x128xf32, #tpu.memory_space<vmem>>, vector<128x128xf32>
      %13 = arith.truncf %12 : vector<128x128xf32> to vector<128x128xbf16>
      %c0_12 = arith.constant 0 : index
      %c0_13 = arith.constant 0 : index
      %14 = vector.load %arg5[%c0_12, %c0_13] : memref<128x128xbf16, #tpu.memory_space<vmem>>, vector<128x128xbf16>
      tpu.vector_store %arg5[%c0_12, %c0_13], %13 {strides = array<i32>} : memref<128x128xbf16, #tpu.memory_space<vmem>>, vector<128x128xbf16>,
    } else {
    }
    return
  }
  func.func @transform_0(%arg0: i32, %arg1: i32, %arg2: i32) -> (i32, i32) {
    %c0_i32 = arith.constant 0 : i32
    return %arg0, %arg2 : i32, i32
  }
  func.func @transform_1(%arg0: i32, %arg1: i32, %arg2: i32) -> (i32, i32) {
    %c0_i32 = arith.constant 0 : i32
    return %arg2, %arg1 : i32, i32
  }
  func.func @transform_2(%arg0: i32, %arg1: i32, %arg2: i32) -> (i32, i32) {
    %c0_i32 = arith.constant 0 : i32
    return %arg0, %arg1 : i32, i32
  }
}

</mosaic_0001>

<bundles_post_ra>
// kernel: tpu_custom_call.1
= control target key start
LH: loop header
LB: loop body
LE: loop exit
PB: predicated region body
PF: predicated region fallthrough
CT: control target
= control target key end

     0   :  { %7 = vsyncpa [#allocation4], 0  ;;  %s1398_s0 = inlined_call_operand.hbm [shape: bf16[128,128], index: 0, kind: input, shape index: {}]   ;;  %s1399_s1 = inlined_call_operand.hbm [shape: bf16[128,384], index: 1, kind: input, shape index: {}]   ;;  %s1400_s2 = inlined_call_operand.hbm [shape: bf16[128,384], index: 2, kind: output, shape index: {}]  }
   0x1   :  { %8 = vsyncpa [#allocation7], 0 }
   0x2   :  { %10 = vsyncpa [#allocation7 + $0x1], 0 }
   0x3   :  { %11 = vsyncpa [#allocation5], 0 }
   0x4   :  { %13 = vsyncpa [#allocation5 + $0x1], 0  ;;  %s1168_s9 = smov 0   ;;  %s1170_s10 = smov 0  }
   0x5   :  { %s1172_s11 = smov 0   ;;  %s1174_s12 = smov 0  }
   0x6   :  { %s1176_s13 = smov 0   ;;  %s1178_s14 = smov 0  }
   0x7 LB: > { %s729_s15 = sadd.s32 4294967295, %s1142_s14   ;;  %s730_s16 = sadd.s32 4294967294, %s1142_s14   ;;  %s1142_s14 = sphi %s1178_s14, %s19_s14   ;;  %s1138_s13 = sphi %s1176_s13, %s1425_s13   ;;  %s1134_s12 = sphi %s1174_s12, %s1424_s12   ;;  %s1130_s11 = sphi %s1172_s11, %s1423_s11   ;;  %s1126_s10 = sphi %s1170_s10, %s1422_s10   ;;  %s1122_s9 = sphi %s1168_s9, %s1421_s9  }
   0x8   : > { %p82_p0 = scmp.ne.s32.totalorder %s1130_s11, %s1126_s10  ;;  %p83_p1 = scmp.eq.s32.totalorder %s1142_s14, 0 }
   0x9   : > { %p88_p2 = scmp.ne.s32.totalorder %s1126_s10, %s1122_s9  ;;  %p1205_p3 = scmp.eq.s32.totalorder %s729_s15, 0 }
   0xa   : > { %p1209_p4 = por %p83_p1, %p82_p0  ;;  %p114_p5 = scmp.eq.s32.totalorder %s729_s15, 2 }
   0xb   : > { %s1407_s17 = scalar_select %p1205_p3, 1, 0 }
   0xc   : > { %p1215_p6 = por %p1205_p3, %p88_p2  ;;  %p120_p7 = scmp.eq.s32.totalorder %s730_s16, 2 }
   0xd   : > { %p1219_p8 = por %p114_p5, %p82_p0  ;;  %p731_p9 = scmp.ge.s32.totalorder %s1142_s14, 1 }
   0xe   : > { %s1409_s19 = scalar_select %p1215_p6, 1, 0 }
   0xf   : > { %s1410_s20 = scalar_select %p1219_p8, 1, 0 }
  0x10   : > { %p1224_p10 = por %p120_p7, %p88_p2  ;;  %p127_p11 = scmp.lt.s32.totalorder %s1142_s14, 4 }
  0x11   : > { %s1144_s23 = smov [#allocation3]   ;;  %p924_p0 = scmp.lt.s32.totalorder %s1142_s14, 3 }
  0x12   : > { %s1411_s21 = scalar_select %p1224_p10, 1, 0 }
  0x13   : > { %p1229_p12 = pnand %p731_p9, %p127_p11  ;;  %s143_s24 = sshll.u32 %s1144_s23, 4  ;;  %s144_s24 = int_to_ptr.vmem [resolvable:$true] %s143_s24 }
  0x14   : > { %p1244_p2 = pnand %p924_p0, %p1209_p4  ;;  %s34_s27 = sadd.s32 1, %s1138_s13 }
  0x15   : > { %s1412_s22 = scalar_select %p1229_p12, 1, 0 }
  0x16   : > { %p911_p13 = pneg %p1229_p12  ;;  %s998_s30 = scalar_lea.hbm %s1398_s0, 1024 }
  0x17   : > { %s1414_s26 = scalar_select %p1244_p2, 1, 0 }
  0x18   : > { %p1238_p1 = pnand %p911_p13, %p1205_p3  ;;  %p999_p5 = scmp.ne.s32.totalorder %s1398_s0, %s998_s30 }
  0x19   : > { %p1005_p4 = scmp.lt.u32.totalorder %s998_s30, %s1398_s0 }
  0x1a   : > { %p1000_p7 = pneg %p1238_p1 }
  0x1c   : > { %p1001_p9 = pnand %p1000_p7, %p999_p5 }
  0x1e   : > { %p1002_p11 = pneg %p1001_p9 }
  0x20   : > { %p1007_p13 = pnand %p1005_p4, %p1002_p11 }
  0x22   : > { %1010 = shalt.err (!%p1007_p13)
}
  0x23   : > { %s1011_s7 = scalar_lea.vmem %s144_s24, 1024  ;;  %p1019_p6 = scmp.lt.s32.totalorder %s144_s24, %s144_s24 }
  0x24   : > { %p1012_p0 = scmp.ne.s32.totalorder %s144_s24, %s1011_s7  ;;  %p1020_p3 = scmp.lt.s32.totalorder %s1011_s7, %s1011_s7 }
  0x26   : > { %p1014_p10 = pnand %p1012_p0, %p1000_p7  ;;  %p1021_p12 = por %p1020_p3, %p1019_p6 }
  0x28   : > { %p1015_p8 = pneg %p1014_p10 }
  0x2a   : > { %p1022_p2 = pnand %p1021_p12, %p1015_p8 }
  0x2c   : > { %1025 = shalt.err (!%p1022_p2)
}
  0x2d   : > { %s1145_s8 = smov 64   ;;  %s1146_s15 = smov 4  }
  0x2e   : > { %914 = dma.hbm_to_vmem [thread:$0]  (!%p1238_p1), %s1398_s0, 1024, %s144_s24, [#allocation4], %s1145_s8, %s1145_s8, %s1146_s15  }
  0x2f   : > { %p36_p10 = scmp.ge.s32.totalorder %s34_s27, 3  ;;  %s75_s23 = sadd.s32 1, %s1130_s11 }
  0x30   : > { %s157_s28 = sand.u32 1, %s1130_s11   ;;  %s735_s3 = sshll.u32 %s1138_s13, 6 }
  0x31   : > { %s1427_s27 = smov (%p36_p10, %s34_s27), 0  ;;  %s734_s29 = sshll.u32 %s157_s28, 6 }
  0x32   : > { %s71_s30 = ssub.s32 %s1138_s13, %s1427_s27  ;;  %s1278_s5 = scalar_lea.hbm %s1399_s1, %s735_s3 }
  0x33   : > { %p73_p3 = scmp.eq.s32.totalorder %s71_s30, 0  ;;  %s161_s24 = scalar_lea.vmem [#allocation6], %s734_s29 }
  0x34   : > { %s170_s6 = sshll.u32 %s161_s24, 4  ;;  %s1285_s16 = scalar_lea.sflag [#allocation7], %s157_s28  ;;  %s1283_s6 = int_to_ptr.vmem [resolvable:$true] %s170_s6 }
  0x35   : > { %s1281_s7 = scalar_select %p73_p3, %s1130_s11, %s75_s23  }
  0x36   : > { %s1026_s18 = scalar_lea.hbm %s1278_s5, 1024  ;;  %p1415_p8 = scmp.ne.s32.totalorder %s1414_s26, 0 }
  0x37   : > { %p1027_p6 = scmp.ne.s32.totalorder %s1278_s5, %s1026_s18  ;;  %s1031_s25 = scalar_lea.hbm %s1399_s1, 3072 }
  0x38   : > { %p1028_p12 = pneg %p1415_p8  ;;  %p1032_p5 = scmp.lt.u32.totalorder %s1278_s5, %s1399_s1 }
  0x39   : > { %p1033_p7 = scmp.lt.u32.totalorder %s1031_s25, %s1026_s18  ;;  %p1035_p11 = scmp.lt.u32.totalorder %s1026_s18, %s1278_s5 }
  0x3a   : > { %p1029_p1 = pnand %p1028_p12, %p1027_p6 }
  0x3b   : > { %p1034_p9 = por %p1033_p7, %p1032_p5 }
  0x3c   : > { %p1030_p2 = pneg %p1029_p1 }
  0x3d   : > { %p1036_p4 = por %p1035_p11, %p1034_p9 }
  0x3f   : > { %p1037_p13 = pnand %p1036_p4, %p1030_p2 }
  0x41   : > { %1040 = shalt.err (!%p1037_p13)
}
  0x42   : > { %s1041_s23 = scalar_lea.vmem %s1283_s6, 1024  ;;  %s1147_s28 = smov [#allocation6]  }
  0x43   : > { %p1042_p0 = scmp.ne.s32.totalorder %s1283_s6, %s1041_s23  ;;  %s1046_s24 = sshll.u32 %s1147_s28, 4  ;;  %s1047_s24 = int_to_ptr.vmem [resolvable:$false] %s1046_s24 }
  0x44   : > { %s1048_s30 = scalar_lea.vmem %s1047_s24, 2048  ;;  %p1049_p6 = scmp.lt.s32.totalorder %s1283_s6, %s1047_s24 }
  0x45   : > { %p1044_p10 = pnand %p1042_p0, %p1028_p12  ;;  %p1050_p1 = scmp.lt.s32.totalorder %s1048_s30, %s1041_s23 }
  0x47   : > { %p1045_p3 = pneg %p1044_p10  ;;  %p1051_p5 = por %p1050_p1, %p1049_p6 }
  0x49   : > { %p1052_p7 = pnand %p1051_p5, %p1045_p3 }
  0x4b   : > { %1055 = shalt.err (!%p1052_p7)
}
  0x4c   : > { %s1148_s18 = smov 192   ;;  %p1416_p12 = scmp.ne.s32.totalorder %s1412_s22, 0 }
  0x4d   : > { %918 = dma.hbm_to_vmem [thread:$0]  (!%p1415_p8), %s1278_s5, 1024, %s1283_s6, %s1285_s16, %s1148_s18, %s1145_s8, %s1146_s15  }
  0x4e   : > { %182 = sbr.rel (%p1416_p12) target bundleno = 364 (0x16c), region = 28  ;;  %p1417_p2 = scmp.ne.s32.totalorder (!%p1416_p12), %s1407_s17, 0 }
  0x55   : > { %1109 = dma.done.wait (%p1417_p2), [#allocation4], 1024  }
  0x56   : > { %1111 = vsyncadd (%p1417_p2), [#allocation4], 4294966272  ;;  %s1322_s3 = sand.u32 1, %s1126_s10   ;;  %p1418_p8 = scmp.ne.s32.totalorder %s1409_s19, 0 }
  0x57   : > { %s738_s26 = sshll.u32 %s1322_s3, 6  ;;  %s189_s25 = scalar_lea.sflag [#allocation7], %s1322_s3 }
  0x58   : > { %s1328_s8 = scalar_lea.vmem [#allocation6], %s738_s26 }
  0x59   : > { %1113 = dma.done.wait (%p1418_p8), %s189_s25, 1024  }
  0x5a   : > { %1115 = vsyncadd (%p1418_p8), %s189_s25, 4294966272  ;;  %v982_v0 = vld [vmem:[%s1328_s8] sm:$0xff]   ;;  %v983_v1 = vld [vmem:[%s1328_s8 + $0x8] sm:$0xff]   ;;  %s212_s17 = scalar_lea.vmem [#allocation8], %s738_s26  ;;  %s773_s22 = sshll.u32 %s1134_s12, 6 }
  0x5b   : > { %855 = vmatprep.subr.bf16.mxu0 %v982_v0  ;;  %887 = vmatprep.subr.bf16.mxu1 %v982_v0  ;;  %v984_v2 = vld [vmem:[%s1328_s8 + $0x10] sm:$0xff]   ;;  %v985_v3 = vld [vmem:[%s1328_s8 + $0x18] sm:$0xff]   ;;  %v990_v4 = vld [vmem:[#allocation3] sm:$0xff]   ;;  %s625_s19 = sshll.u32 %s212_s17, 4  ;;  %s1350_s6 = scalar_lea.hbm %s1400_s2, %s773_s22  ;;  %s1345_s19 = int_to_ptr.vmem [resolvable:$true] %s625_s19 }
  0x5c   : > { %856 = vmatpush3.bf16.msra.mxu0 %v982_v0  ;;  %895 = vmatpush3.bf16.msra.mxu1 %v982_v0  ;;  %v991_v5 = vld [vmem:[#allocation3 + $0x20] sm:$0xff]   ;;  %v987_v7 = vld [vmem:[%s1328_s8 + $0x28] sm:$0xff]   ;;  %v988_v8 = vld [vmem:[%s1328_s8 + $0x30] sm:$0xff]   ;;  %s610_s12 = scalar_lea.sflag [#allocation5], %s1322_s3  ;;  %s1056_s16 = scalar_lea.vmem %s1345_s19, 1024 }
  0x5d   : > { %857 = vmatprep.subr.bf16.mxu0 %v983_v1  ;;  %888 = vmatprep.subr.bf16.mxu1 %v983_v1  ;;  %v986_v6 = vld [vmem:[%s1328_s8 + $0x20] sm:$0xff]   ;;  %v989_v9 = vld [vmem:[%s1328_s8 + $0x38] sm:$0xff]   ;;  %v992_v10 = vld [vmem:[#allocation3 + $0x8] sm:$0xff]   ;;  %p1057_p9 = scmp.ne.s32.totalorder %s1345_s19, %s1056_s16  ;;  %p1419_p11 = scmp.ne.s32.totalorder %s1410_s20, 0 }
  0x5e   : > { %871 = vmatprep.mubr.bf16.mxu0 %v990_v4  ;;  %879 = vmatprep.mubr.bf16.mxu1 %v991_v5  ;;  %v993_v11 = vld [vmem:[#allocation3 + $0x28] sm:$0xff]   ;;  %v994_v12 = vld [vmem:[#allocation3 + $0x10] sm:$0xff]   ;;  %v996_v14 = vld [vmem:[#allocation3 + $0x18] sm:$0xff]   ;;  %s1149_s29 = smov [#allocation8]  }
  0x5f   : > { %v995_v13 = vld [vmem:[#allocation3 + $0x30] sm:$0xff]   ;;  %v997_v15 = vld [vmem:[#allocation3 + $0x38] sm:$0xff]   ;;  %p1058_p4 = pnand %p1057_p9, %p1419_p11  ;;  %s1060_s4 = sshll.u32 %s1149_s29, 4  ;;  %s1061_s4 = int_to_ptr.vmem [resolvable:$false] %s1060_s4 }
  0x60   : > { %858 = vmatpush3.bf16.msra.mxu0 %v983_v1  ;;  %896 = vmatpush3.bf16.msra.mxu1 %v983_v1  ;;  %s1062_s23 = scalar_lea.vmem %s1061_s4, 2048  ;;  %p1063_p0 = scmp.lt.s32.totalorder %s1345_s19, %s1061_s4 }
  0x61   : > { %859 = vmatprep.subr.bf16.mxu0 %v984_v2  ;;  %889 = vmatprep.subr.bf16.mxu1 %v984_v2  ;;  %p1059_p13 = pneg %p1058_p4  ;;  %p1064_p10 = scmp.lt.s32.totalorder %s1062_s23, %s1056_s16 }
  0x63   : > { %p1065_p3 = por %p1064_p10, %p1063_p0 }
  0x64   : > { %860 = vmatpush3.bf16.msra.mxu0 %v984_v2  ;;  %897 = vmatpush3.bf16.msra.mxu1 %v984_v2 }
  0x65   : > { %861 = vmatprep.subr.bf16.mxu0 %v985_v3  ;;  %890 = vmatprep.subr.bf16.mxu1 %v985_v3  ;;  %p1066_p6 = pnand %p1065_p3, %p1059_p13 }
  0x68   : > { %862 = vmatpush3.bf16.msra.mxu0 %v985_v3  ;;  %898 = vmatpush3.bf16.msra.mxu1 %v985_v3 }
  0x69   : > { %863 = vmatprep.subr.bf16.mxu0 %v986_v6  ;;  %891 = vmatprep.subr.bf16.mxu1 %v986_v6 }
  0x6c   : > { %864 = vmatpush3.bf16.msra.mxu0 %v986_v6  ;;  %899 = vmatpush3.bf16.msra.mxu1 %v986_v6 }
  0x6d   : > { %865 = vmatprep.subr.bf16.mxu0 %v987_v7  ;;  %892 = vmatprep.subr.bf16.mxu1 %v987_v7 }
  0x70   : > { %866 = vmatpush3.bf16.msra.mxu0 %v987_v7  ;;  %900 = vmatpush3.bf16.msra.mxu1 %v987_v7 }
  0x71   : > { %867 = vmatprep.subr.bf16.mxu0 %v988_v8  ;;  %893 = vmatprep.subr.bf16.mxu1 %v988_v8 }
  0x74   : > { %868 = vmatpush3.bf16.msra.mxu0 %v988_v8  ;;  %901 = vmatpush3.bf16.msra.mxu1 %v988_v8 }
  0x75   : > { %869 = vmatprep.subr.bf16.mxu0 %v989_v9  ;;  %894 = vmatprep.subr.bf16.mxu1 %v989_v9 }
  0x78   : > { %870 = vmatpush3.bf16.msra.mxu0 %v989_v9  ;;  %902 = vmatpush3.bf16.msra.mxu1 %v989_v9 }
  0x7b   : > { %872 = vmatmul.mubr.bf16.vlgmr.msra.gmra.mrb[0].mxu0 %v992_v10  ;;  %880 = vmatmul.mubr.bf16.vlgmr.msra.gmra.mrb[0].mxu1 %v993_v11 }
  0x7c   : > { %875 = vmatprep.mubr.bf16.mxu0 %v994_v12  ;;  %883 = vmatprep.mubr.bf16.mxu1 %v995_v13 }
  0x83   : > { %876 = vmatmul.mubr.bf16.gmra.mrb[4].mxu0 %v996_v14  ;;  %884 = vmatmul.mubr.bf16.gmra.mrb[4].mxu1 %v997_v15 }
 0x14e   : > { %v873_v16 = vpop.f32.mrb[0].mxu0  ;;  %v881_v17 = vpop.f32.mrb[0].mxu1 }
 0x14f   : > { %v415_v18 = vpop.f32.mrb[1].mxu0  ;;  %v447_v19 = vpop.f32.mrb[1].mxu1 }
 0x150   : > { %v874_v20 = vpop.f32.mrb[2].mxu0  ;;  %v882_v21 = vpop.f32.mrb[2].mxu1 }
 0x151   : > { %v800_v22 = vpack.c.bf16 %v874_v20, %v873_v16  ;;  %v820_v23 = vpack.c.bf16 %v882_v21, %v881_v17  ;;  %v418_v24 = vpop.f32.mrb[3].mxu0  ;;  %v450_v25 = vpop.f32.mrb[3].mxu1 }
 0x152   : > { %v795_v26 = vpack.c.bf16 %v418_v24, %v415_v18  ;;  %v815_v27 = vpack.c.bf16 %v450_v25, %v447_v19 }
 0x153   : > { %832 = vst [vmem:[%s212_s17 + $0x8] sm:$0xff] %v800_v22   ;;  %836 = vst [vmem:[%s212_s17 + $0x28] sm:$0xff] %v820_v23  }
 0x154   : > { %796 = vst [vmem:[%s212_s17] sm:$0xff] %v795_v26   ;;  %835 = vst [vmem:[%s212_s17 + $0x20] sm:$0xff] %v815_v27  }
 0x156   : > { %v877_v28 = vpop.f32.mrb[4].mxu0  ;;  %v885_v29 = vpop.f32.mrb[4].mxu1 }
 0x157   : > { %v431_v30 = vpop.f32.mrb[5].mxu0  ;;  %v463_v31 = vpop.f32.mrb[5].mxu1 }
 0x158   : > { %v878_v32 = vpop.f32.mrb[6].mxu0  ;;  %v886_v33 = vpop.f32.mrb[6].mxu1 }
 0x159   : > { %v810_v34 = vpack.c.bf16 %v878_v32, %v877_v28  ;;  %v830_v35 = vpack.c.bf16 %v886_v33, %v885_v29  ;;  %v434_v36 = vpop.f32.mrb[7].mxu0  ;;  %v466_v37 = vpop.f32.mrb[7].mxu1 }
 0x15a   : > { %v805_v38 = vpack.c.bf16 %v434_v36, %v431_v30  ;;  %v825_v39 = vpack.c.bf16 %v466_v37, %v463_v31 }
 0x15b   : > { %834 = vst [vmem:[%s212_s17 + $0x18] sm:$0xff] %v810_v34   ;;  %838 = vst [vmem:[%s212_s17 + $0x38] sm:$0xff] %v830_v35  }
 0x15c   : > { %833 = vst [vmem:[%s212_s17 + $0x10] sm:$0xff] %v805_v38   ;;  %837 = vst [vmem:[%s212_s17 + $0x30] sm:$0xff] %v825_v39  }
 0x15d   : > { %1069 = shalt.err (!%p1066_p6)
}
 0x15e   : > { %s1070_s28 = scalar_lea.hbm %s1350_s6, 1024  ;;  %s1074_s18 = scalar_lea.hbm %s1400_s2, 3072 }
 0x15f   : > { %p1071_p1 = scmp.ne.s32.totalorder %s1350_s6, %s1070_s28  ;;  %p1075_p12 = scmp.lt.u32.totalorder %s1350_s6, %s1400_s2 }
 0x160   : > { %p1076_p2 = scmp.lt.u32.totalorder %s1074_s18, %s1070_s28  ;;  %p1078_p9 = scmp.lt.u32.totalorder %s1070_s28, %s1350_s6 }
 0x161   : > { %p1072_p5 = pnand %p1071_p1, %p1419_p11 }
 0x162   : > { %p1077_p8 = por %p1076_p2, %p1075_p12 }
 0x163   : > { %p1073_p7 = pneg %p1072_p5 }
 0x164   : > { %p1079_p4 = por %p1078_p9, %p1077_p8 }
 0x166   : > { %p1080_p13 = pnand %p1079_p4, %p1073_p7 }
 0x168   : > { %1083 = shalt.err (!%p1080_p13)
}
 0x169   : > { %s1150_s8 = smov 64   ;;  %s1151_s17 = smov 192  }
 0x16a   : > { %s1152_s22 = smov 4  }
 0x16b   : > { %909 = dma.vmem_to_hbm [thread:$0]  (%p1419_p11), %s1345_s19, 1024, %s1350_s6, %s610_s12, %s1150_s8, %s1151_s17, %s1152_s22  }
 0x16c PF: > { %p926_p0 = scmp.ge.s32.totalorder %s1142_s14, 2  ;;  %s640_s15 = sand.u32 1, %s1122_s9  }
 0x16d   : > { %p1420_p10 = scmp.ne.s32.totalorder %s1411_s21, 0  ;;  %s641_s5 = scalar_lea.sflag [#allocation5], %s640_s15 }
 0x16f   : > { %p920_p3 = pnand %p926_p0, %p1420_p10 }
 0x171   : > { %1117 = dma.done.wait (!%p920_p3), %s641_s5, 1024  }
 0x172   : > { %1119 = vsyncadd (!%p920_p3), %s641_s5, 4294966272  ;;  %s19_s14 = sadd.s32 1, %s1142_s14   ;;  %s1421_s9 = smov %s1126_s10 }
 0x173   : > { %p16_p6 = scmp.ge.s32.totalorder %s19_s14, 5   ;;  %s1422_s10 = smov %s1130_s11 }
 0x174   : > { %s1423_s11 = smov %s1281_s7  ;;  %s1424_s12 = smov %s1138_s13 }
 0x175   : > { %s1425_s13 = smov %s1427_s27  ;;  %18 = sbr.rel (!%p16_p6) target bundleno = 7 (0x7), region = 87 }
 0x17c   :  { %646 = vsyncpa [#allocation4], 1 }
 0x17d   :  { %648 = vsyncpa [#allocation4 + $0x1], 1 }
 0x17e   :  { %649 = vsyncpa [#allocation7], 1 }
 0x17f   :  { %651 = vsyncpa [#allocation7 + $0x1], 1 }
 0x180   :  { %652 = vsyncpa [#allocation5], 1 }
 0x181   :  { %654 = vsyncpa [#allocation5 + $0x1], 1 }

</bundles_post_ra>
